<compile_context>
chip_gen: v7x
topology: tpu7x:2x2x1
jax: 0.10.0
libtpu: 0.0.40
codegen_flags: <defaults>
</compile_context>

<pallas_src>
import functools

import jax
import jax.numpy as jnp
from jax.experimental import pallas as pl
from jax.experimental.pallas import tpu as pltpu


def _tv_kernel(x_ref, h_ref, w_ref):
    """One (C_BLK, H, W) channel block -> accumulated h_tv / w_tv partials.

    x_ref: (C_BLK, H, W) input block (any float dtype)
    h_ref: (1, 1) float32 accumulator for squared vertical   differences
    w_ref: (1, 1) float32 accumulator for squared horizontal differences
    (output block index is constant across the inner grid axis, so these
    refs are VMEM-resident accumulators across all channel blocks of one n.)
    """
    c = pl.program_id(1)

    @pl.when(c == 0)
    def _():
        h_ref[...] = jnp.zeros_like(h_ref)
        w_ref[...] = jnp.zeros_like(w_ref)

    x = x_ref[...].astype(jnp.float32)              # (C_BLK, H, W)
    dh = x[:, 1:, :] - x[:, :-1, :]                 # (C_BLK, H-1, W)
    dw = x[:, :, 1:] - x[:, :, :-1]                 # (C_BLK, H, W-1)
    h_ref[...] += jnp.sum(dh * dh)
    w_ref[...] += jnp.sum(dw * dw)


def _pick_c_block(C, plane_bytes, budget_bytes=1 << 20):
    """Largest divisor of C whose block stays within ~budget_bytes (>= 1)."""
    best = 1
    for d in range(1, C + 1):
        if C % d == 0 and d * plane_bytes <= budget_bytes:
            best = d
    return best


@functools.partial(jax.jit, static_argnames=("tv_weight",))
def tv_loss(x, tv_weight=1.0):
    """JAX/Pallas equivalent of TVLoss.forward. x: (N, C, H, W)."""
    N, C, H, W = x.shape
    plane_bytes = H * W * x.dtype.itemsize
    c_blk = _pick_c_block(C, plane_bytes)
    n_cblk = C // c_blk

    h_part, w_part = pl.pallas_call(
        _tv_kernel,
        out_shape=(
            jax.ShapeDtypeStruct((N, 1, 1), jnp.float32),
            jax.ShapeDtypeStruct((N, 1, 1), jnp.float32),
        ),
        grid_spec=pltpu.PrefetchScalarGridSpec(
            num_scalar_prefetch=0,
            grid=(N, n_cblk),
            in_specs=[
                # None dim is squeezed: the kernel sees a (c_blk, H, W) block.
                pl.BlockSpec((None, c_blk, H, W), lambda n, c: (n, c, 0, 0)),
            ],
            out_specs=(
                # Constant block index across the inner (reduction) axis
                # -> resident accumulator, written back once per n.
                pl.BlockSpec((None, 1, 1), lambda n, c: (n, 0, 0)),
                pl.BlockSpec((None, 1, 1), lambda n, c: (n, 0, 0)),
            ),
        ),
        compiler_params=pltpu.CompilerParams(
            dimension_semantics=("parallel", "arbitrary"),
            vmem_limit_bytes=32 << 20,
        ),
    )(x)

    # O(N) final reduction + scalar normalisation: plain-JAX glue.
    h_tv = jnp.sum(h_part)
    w_tv = jnp.sum(w_part)
    count_h = C * (H - 1) * W
    count_w = C * H * (W - 1)
    return tv_weight * 2.0 * (h_tv / count_h + w_tv / count_w) / N


def _tv_loss_ref(x, tv_weight=1.0):
    """Pure-JAX reference (mirrors the PyTorch forward)."""
    N, C, H, W = x.shape
    h_tv = jnp.sum((x[:, :, 1:, :] - x[:, :, :-1, :]) ** 2)
    w_tv = jnp.sum((x[:, :, :, 1:] - x[:, :, :, :-1]) ** 2)
    count_h = C * (H - 1) * W
    count_w = C * H * (W - 1)
    return tv_weight * 2.0 * (h_tv / count_h + w_tv / count_w) / N


if __name__ == "__main__":
    key = jax.random.PRNGKey(0)
    N, C, H, W = 2, 4, 16, 16
    x = jax.random.normal(key, (N, C, H, W), dtype=jnp.float32)

    out = tv_loss(x)
    out = jax.block_until_ready(out)

    ref = _tv_loss_ref(x)
    assert out.shape == ()
    assert bool(jnp.isfinite(out))
    assert jnp.allclose(out, ref, rtol=1e-5, atol=1e-5), (out, ref)
    print("KERNEL_OK")
</pallas_src>

<mosaic_0001>
module attributes {stable_mosaic.version = 11 : i64} {
  func.func @_tv_kernel(%arg0: i32, %arg1: i32, %arg2: memref<1x4x16x16xf32, #tpu.memory_space<vmem>>, %arg3: memref<1x1x1xf32, #tpu.memory_space<vmem>>, %arg4: memref<1x1x1xf32, #tpu.memory_space<vmem>>) attributes {dimension_semantics = [#tpu.dimension_semantics<parallel>, #tpu.dimension_semantics<arbitrary>], iteration_bounds = array<i64: 2, 1>, scalar_prefetch = 0 : i64, scratch_operands = 0 : i64, tpu.core_type = #tpu.core_type<tc>, window_params = [{transform_indices = @transform_0, window_bounds = array<i64: 1, 4, 16, 16>}, {transform_indices = @transform_1, window_bounds = array<i64: 1, 1, 1>}, {transform_indices = @transform_2, window_bounds = array<i64: 1, 1, 1>}]} {
    %c0_i32 = arith.constant 0 : i32
    %0 = arith.cmpi eq, %arg1, %c0_i32 : i32
    %1 = arith.extui %0 : i1 to i32
    %c0_i32_0 = arith.constant 0 : i32
    %2 = arith.cmpi ne, %1, %c0_i32_0 : i32
    scf.if %2 {
      %cst_17 = arith.constant 0.000000e+00 : f32
      %35 = vector.broadcast %cst_17 : f32 to vector<1x1xf32>
      %c0_18 = arith.constant 0 : index
      %c0_19 = arith.constant 0 : index
      %c0_20 = arith.constant 0 : index
      %36 = vector.load %arg3[%c0_18, %c0_19, %c0_20] : memref<1x1x1xf32, #tpu.memory_space<vmem>>, vector<1x1x1xf32>
      %37 = vector.shape_cast %36 : vector<1x1x1xf32> to vector<1x1xf32>
      %38 = vector.shape_cast %35 : vector<1x1xf32> to vector<1x1x1xf32>
      tpu.vector_store %arg3[%c0_18, %c0_19, %c0_20], %38 {strides = array<i32>} : memref<1x1x1xf32, #tpu.memory_space<vmem>>, vector<1x1x1xf32>,
      %cst_21 = arith.constant 0.000000e+00 : f32
      %39 = vector.broadcast %cst_21 : f32 to vector<1x1xf32>
      %c0_22 = arith.constant 0 : index
      %c0_23 = arith.constant 0 : index
      %c0_24 = arith.constant 0 : index
      %40 = vector.load %arg4[%c0_22, %c0_23, %c0_24] : memref<1x1x1xf32, #tpu.memory_space<vmem>>, vector<1x1x1xf32>
      %41 = vector.shape_cast %40 : vector<1x1x1xf32> to vector<1x1xf32>
      %42 = vector.shape_cast %39 : vector<1x1xf32> to vector<1x1x1xf32>
      tpu.vector_store %arg4[%c0_22, %c0_23, %c0_24], %42 {strides = array<i32>} : memref<1x1x1xf32, #tpu.memory_space<vmem>>, vector<1x1x1xf32>,
    } else {
    }
    %c0 = arith.constant 0 : index
    %c0_1 = arith.constant 0 : index
    %c0_2 = arith.constant 0 : index
    %c0_3 = arith.constant 0 : index
    %3 = vector.load %arg2[%c0, %c0_1, %c0_2, %c0_3] : memref<1x4x16x16xf32, #tpu.memory_space<vmem>>, vector<1x4x16x16xf32>
    %4 = vector.shape_cast %3 : vector<1x4x16x16xf32> to vector<4x16x16xf32>
    %5 = vector.extract_strided_slice %4 {offsets = [0, 1, 0], sizes = [4, 15, 16], strides = [1, 1, 1]} : vector<4x16x16xf32> to vector<4x15x16xf32>
    %6 = vector.extract_strided_slice %4 {offsets = [0, 0, 0], sizes = [4, 15, 16], strides = [1, 1, 1]} : vector<4x16x16xf32> to vector<4x15x16xf32>
    %7 = arith.subf %5, %6 : vector<4x15x16xf32>
    %8 = vector.extract_strided_slice %4 {offsets = [0, 0, 1], sizes = [4, 16, 15], strides = [1, 1, 1]} : vector<4x16x16xf32> to vector<4x16x15xf32>
    %9 = vector.extract_strided_slice %4 {offsets = [0, 0, 0], sizes = [4, 16, 15], strides = [1, 1, 1]} : vector<4x16x16xf32> to vector<4x16x15xf32>
    %10 = arith.subf %8, %9 : vector<4x16x15xf32>
    %c0_4 = arith.constant 0 : index
    %c0_5 = arith.constant 0 : index
    %c0_6 = arith.constant 0 : index
    %11 = vector.load %arg3[%c0_4, %c0_5, %c0_6] : memref<1x1x1xf32, #tpu.memory_space<vmem>>, vector<1x1x1xf32>
    %12 = vector.shape_cast %11 : vector<1x1x1xf32> to vector<1x1xf32>
    %13 = arith.mulf %7, %7 : vector<4x15x16xf32>
    %14 = vector.shape_cast %13 : vector<4x15x16xf32> to vector<1x4x15x16xf32>
    %cst = arith.constant dense<0.000000e+00> : vector<1xf32>
    %15 = vector.multi_reduction <add>, %14, %cst [1, 2, 3] : vector<1x4x15x16xf32> to vector<1xf32>
    %16 = vector.shape_cast %15 : vector<1xf32> to vector<1x1x1x1xf32>
    %17 = vector.extract %16[0, 0, 0, 0] : f32 from vector<1x1x1x1xf32>
    %18 = vector.broadcast %17 : f32 to vector<1x1xf32>
    %19 = arith.addf %12, %18 : vector<1x1xf32>
    %c0_7 = arith.constant 0 : index
    %c0_8 = arith.constant 0 : index
    %c0_9 = arith.constant 0 : index
    %20 = vector.load %arg3[%c0_7, %c0_8, %c0_9] : memref<1x1x1xf32, #tpu.memory_space<vmem>>, vector<1x1x1xf32>
    %21 = vector.shape_cast %20 : vector<1x1x1xf32> to vector<1x1xf32>
    %22 = vector.shape_cast %19 : vector<1x1xf32> to vector<1x1x1xf32>
    tpu.vector_store %arg3[%c0_7, %c0_8, %c0_9], %22 {strides = array<i32>} : memref<1x1x1xf32, #tpu.memory_space<vmem>>, vector<1x1x1xf32>,
    %c0_10 = arith.constant 0 : index
    %c0_11 = arith.constant 0 : index
    %c0_12 = arith.constant 0 : index
    %23 = vector.load %arg4[%c0_10, %c0_11, %c0_12] : memref<1x1x1xf32, #tpu.memory_space<vmem>>, vector<1x1x1xf32>
    %24 = vector.shape_cast %23 : vector<1x1x1xf32> to vector<1x1xf32>
    %25 = arith.mulf %10, %10 : vector<4x16x15xf32>
    %26 = vector.shape_cast %25 : vector<4x16x15xf32> to vector<1x4x16x15xf32>
    %cst_13 = arith.constant dense<0.000000e+00> : vector<1xf32>
    %27 = vector.multi_reduction <add>, %26, %cst_13 [1, 2, 3] : vector<1x4x16x15xf32> to vector<1xf32>
    %28 = vector.shape_cast %27 : vector<1xf32> to vector<1x1x1x1xf32>
    %29 = vector.extract %28[0, 0, 0, 0] : f32 from vector<1x1x1x1xf32>
    %30 = vector.broadcast %29 : f32 to vector<1x1xf32>
    %31 = arith.addf %24, %30 : vector<1x1xf32>
    %c0_14 = arith.constant 0 : index
    %c0_15 = arith.constant 0 : index
    %c0_16 = arith.constant 0 : index
    %32 = vector.load %arg4[%c0_14, %c0_15, %c0_16] : memref<1x1x1xf32, #tpu.memory_space<vmem>>, vector<1x1x1xf32>
    %33 = vector.shape_cast %32 : vector<1x1x1xf32> to vector<1x1xf32>
    %34 = vector.shape_cast %31 : vector<1x1xf32> to vector<1x1x1xf32>
    tpu.vector_store %arg4[%c0_14, %c0_15, %c0_16], %34 {strides = array<i32>} : memref<1x1x1xf32, #tpu.memory_space<vmem>>, vector<1x1x1xf32>,
    return
  }
  func.func @transform_0(%arg0: i32, %arg1: i32) -> (i32, i32, i32, i32) {
    %c0_i32 = arith.constant 0 : i32
    %c0_i32_0 = arith.constant 0 : i32
    %c0_i32_1 = arith.constant 0 : i32
    return %arg0, %arg1, %c0_i32, %c0_i32_0 : i32, i32, i32, i32
  }
  func.func @transform_1(%arg0: i32, %arg1: i32) -> (i32, i32, i32) {
    %c0_i32 = arith.constant 0 : i32
    %c0_i32_0 = arith.constant 0 : i32
    %c0_i32_1 = arith.constant 0 : i32
    return %arg0, %c0_i32, %c0_i32_0 : i32, i32, i32
  }
  func.func @transform_2(%arg0: i32, %arg1: i32) -> (i32, i32, i32) {
    %c0_i32 = arith.constant 0 : i32
    %c0_i32_0 = arith.constant 0 : i32
    %c0_i32_1 = arith.constant 0 : i32
    return %arg0, %c0_i32, %c0_i32_0 : i32, i32, i32
  }
}

</mosaic_0001>

<bundles_post_ra>
// kernel: tv_loss.1
= control target key start
LH: loop header
LB: loop body
LE: loop exit
PB: predicated region body
PF: predicated region fallthrough
CT: control target
= control target key end

     0   :  { %8 = vsyncpa [#allocation3], 0  ;;  %s857_s0 = inlined_call_operand.hbm [shape: f32[2,4,16,16], index: 0, kind: input, shape index: {}]   ;;  %s858_s1 = inlined_call_operand.vmem [shape: f32[2,1,1], index: 1, kind: output, shape index: {0}]   ;;  %s859_s2 = inlined_call_operand.vmem [shape: f32[2,1,1], index: 2, kind: output, shape index: {1}]  }
   0x1   :  { %10 = vsyncpa [#allocation3 + $0x1], 0  ;;  %s682_s9 = smov 0   ;;  %s684_s10 = smov 0  }
   0x2   :  { %s686_s11 = smov 0   ;;  %s688_s12 = smov 0  }
   0x3   :  { %s690_s13 = smov 0   ;;  %s692_s14 = smov 0  }
   0x4 LB: > { %s503_s15 = sadd.s32 4294967295, %s659_s14   ;;  %s28_s16 = sadd.s32 1, %s655_s13  ;;  %s659_s14 = sphi %s692_s14, %s16_s14   ;;  %s655_s13 = sphi %s690_s13, %s867_s13   ;;  %s651_s12 = sphi %s688_s12, %s866_s12   ;;  %s647_s11 = sphi %s686_s11, %s865_s11   ;;  %s643_s10 = sphi %s684_s10, %s864_s10   ;;  %s639_s9 = sphi %s682_s9, %s863_s9  }
   0x5   : > { %p30_p0 = scmp.ge.s32.totalorder %s28_s16, 2  ;;  %s37_s17 = sadd.s32 1, %s647_s11 }
   0x6   : > { %p44_p1 = scmp.ne.s32.totalorder %s647_s11, %s643_s10  ;;  %p45_p2 = scmp.eq.s32.totalorder %s659_s14, 0 }
   0x7   : > { %s869_s16 = smov (%p30_p0, %s28_s16), 0  ;;  %p50_p4 = scmp.ne.s32.totalorder %s643_s10, %s639_s9 }
   0x8   : > { %p718_p3 = por %p45_p2, %p44_p1  ;;  %s32_s19 = ssub.s32 %s655_s13, %s869_s16 }
   0x9   : > { %p51_p5 = scmp.eq.s32.totalorder %s503_s15, 0  ;;  %p35_p6 = scmp.eq.s32.totalorder %s32_s19, 0 }
   0xa   : > { %p525_p8 = scmp.lt.s32.totalorder %s659_s14, 2  ;;  %s126_s22 = sand.u32 1, %s647_s11  }
   0xb   : > { %p725_p7 = por %p51_p5, %p50_p4  ;;  %s514_s23 = sshll.u32 %s655_s13, 10 }
   0xc   : > { %s731_s21 = scalar_select %p35_p6, %s647_s11, %s37_s17  }
   0xd   : > { %s507_s24 = sshll.u32 %s126_s22, 6  ;;  %s738_s27 = scalar_lea.hbm %s857_s0, %s514_s23 }
   0xe   : > { %s130_s28 = scalar_lea.vmem [#allocation2], %s507_s24  ;;  %p742_p9 = pnand %p525_p8, %p718_p3 }
   0xf   : > { %s140_s29 = sshll.u32 %s130_s28, 4  ;;  %s748_s3 = scalar_lea.sflag [#allocation3], %s126_s22  ;;  %s746_s29 = int_to_ptr.vmem [resolvable:$true] %s140_s29 }
  0x10   : > { %s579_s4 = scalar_lea.hbm %s738_s27, 1024  ;;  %p581_p11 = pneg %p742_p9 }
  0x11   : > { %p580_p10 = scmp.ne.s32.totalorder %s738_s27, %s579_s4  ;;  %s584_s7 = scalar_lea.hbm %s857_s0, 2048 }
  0x12   : > { %p585_p0 = scmp.lt.u32.totalorder %s738_s27, %s857_s0  ;;  %p586_p1 = scmp.lt.u32.totalorder %s584_s7, %s579_s4 }
  0x13   : > { %p582_p12 = pnand %p581_p11, %p580_p10  ;;  %p588_p3 = scmp.lt.u32.totalorder %s579_s4, %s738_s27 }
  0x14   : > { %p587_p2 = por %p586_p1, %p585_p0 }
  0x15   : > { %p583_p13 = pneg %p582_p12 }
  0x16   : > { %p589_p4 = por %p588_p3, %p587_p2 }
  0x18   : > { %p590_p5 = pnand %p589_p4, %p583_p13 }
  0x1a   : > { %593 = shalt.err (!%p590_p5)
}
  0x1b   : > { %s594_s15 = scalar_lea.vmem %s746_s29, 1024  ;;  %s661_s17 = smov [#allocation2]  }
  0x1c   : > { %p595_p6 = scmp.ne.s32.totalorder %s746_s29, %s594_s15  ;;  %s599_s18 = sshll.u32 %s661_s17, 4  ;;  %s600_s18 = int_to_ptr.vmem [resolvable:$false] %s599_s18 }
  0x1d   : > { %s601_s19 = scalar_lea.vmem %s600_s18, 2048  ;;  %p602_p12 = scmp.lt.s32.totalorder %s746_s29, %s600_s18 }
  0x1e   : > { %p597_p8 = pnand %p595_p6, %p581_p11  ;;  %p603_p0 = scmp.lt.s32.totalorder %s601_s19, %s594_s15 }
  0x20   : > { %p598_p10 = pneg %p597_p8  ;;  %p604_p1 = por %p603_p0, %p602_p12 }
  0x22   : > { %p605_p2 = pnand %p604_p1, %p598_p10 }
  0x24   : > { %608 = shalt.err (!%p605_p2)
}
  0x25   : > { %s662_s22 = smov 128   ;;  %s663_s23 = smov 8  }
  0x26   : > { %524 = dma.hbm_to_vmem [thread:$0]  (!%p742_p9), %s738_s27, 1024, %s746_s29, %s748_s3, %s662_s22, %s662_s22, %s663_s23  }
  0x27   : > { %p510_p11 = scmp.ge.s32.totalorder %s659_s14, 1  ;;  %p148_p13 = scmp.lt.s32.totalorder %s659_s14, 3 }
  0x29   : > { %p149_p3 = pnand %p510_p11, %p148_p13 }
  0x2a   : > { %s154_s24 = sand.u32 (!%p149_p3), 1, %s643_s10  }
  0x2b   : > { %152 = sbr.rel (%p149_p3) target bundleno = 513 (0x201), region = 24  ;;  %s511_s25 = sshll.u32 (!%p149_p3), %s154_s24, 6 }
  0x2c   : > { %s155_s26 = scalar_lea.sflag (!%p149_p3), [#allocation3], %s154_s24  ;;  %s158_s28 = scalar_lea.vmem (!%p149_p3), [#allocation2], %s511_s25 }
  0x32   : > { %634 = dma.done.wait (%p725_p7), %s155_s26, 1024  }
  0x33   : > { %636 = vsyncadd (%p725_p7), %s155_s26, 4294966272  ;;  %v194_v0 = vld [vmem:[%s158_s28] sm:$0xff]  ;;  %v196_v1 = vld [vmem:[%s158_s28 + $0x10] sm:$0xff]  ;;  %s664_s4 = smov 1   ;;  %vm210_vm0 = vcmask 1040384   ;;  %s665_s20 = smov 127  }
  0x34   : > { %239 = vrot.lane.b32.xlu0 %v194_v0, %s664_s4  ;;  %243 = vrot.lane.b32.xlu1 %v196_v1, %s664_s4  ;;  %v195_v2 = vld [vmem:[%s158_s28 + $0x8] sm:$0xff]  ;;  %v197_v3 = vld [vmem:[%s158_s28 + $0x18] sm:$0xff]  ;;  %v211_v8 = vrot.slane %v194_v0, 7  ;;  %v214_v10 = vrot.slane %v196_v1, 7  ;;  %vm288_vm1 = vcmask 1046528   ;;  %vm309_vm2 = vcmask 130048  }
  0x35   : > { %v198_v4 = vld [vmem:[%s158_s28 + $0x20] sm:$0xff]  ;;  %v199_v5 = vld [vmem:[%s158_s28 + $0x28] sm:$0xff]  ;;  %v783_v6 = vld [vmem:[%s158_s28 + $0x30] sm:$0xff]  ;;  %v212_v9 = vrot.slane %v195_v2, 7  ;;  %v215_v12 = vrot.slane %v197_v3, 7  ;;  %vm311_vm3 = vcmask 129024  }
  0x36   : > { %v785_v7 = vld [vmem:[%s158_s28 + $0x38] sm:$0xff]  ;;  %v231_v17 = vsub.f32 %v194_v0, %v211_v8  ;;  %v233_v21 = vsub.f32 %v196_v1, %v214_v10  ;;  %v217_v22 = vrot.slane %v198_v4, 7  ;;  %v218_v23 = vrot.slane %v199_v5, 7  ;;  %p181_p7 = scmp.lt.s32.totalorder %s651_s12, 1 }
  0x37   : > { %v213_v11 = vsel %vm210_vm0, %v211_v8, %v212_v9  ;;  %v216_v19 = vsel %vm210_vm0, %v214_v10, %v215_v12  ;;  %v220_v54 = vrot.slane %v783_v6, 7  ;;  %v221_v55 = vrot.slane %v785_v7, 7 }
  0x38   : > { %241 = vrot.lane.b32.xlu0 %v195_v2, %s664_s4  ;;  %245 = vrot.lane.b32.xlu1 %v197_v3, %s664_s4  ;;  %v232_v18 = vsub.f32 %v195_v2, %v213_v11  ;;  %v272_v29 = vmul.f32 %v231_v17, %v231_v17  ;;  %v234_v31 = vsub.f32 %v197_v3, %v216_v19  ;;  %vm380_vm4 = vcmask 121856   ;;  %s871_s12 = smov (!%p181_p7, %s651_s12), 1 }
  0x39   : > { %v274_v33 = vmul.f32 %v233_v21, %v233_v21  ;;  %v219_v34 = vsel %vm210_vm0, %v217_v22, %v218_v23  ;;  %v235_v44 = vsub.f32 %v198_v4, %v217_v22  ;;  %v222_v63 = vsel %vm210_vm0, %v220_v54, %v221_v55  ;;  %s183_s30 = scalar_lea.vmem %s858_s1, %s871_s12  ;;  %s186_s6 = scalar_lea.vmem %s859_s2, %s871_s12 }
  0x3a   : > { %v273_v30 = vmul.f32 %v232_v18, %v232_v18  ;;  %v289_v40 = vrot.slane %v272_v29, 1  ;;  %v275_v42 = vmul.f32 %v234_v31, %v234_v31  ;;  %v236_v45 = vsub.f32 %v199_v5, %v219_v34 }
  0x3b   : > { %v292_v48 = vrot.slane %v274_v33, 1  ;;  %v276_v60 = vmul.f32 %v235_v44, %v235_v44  ;;  %vm191_vm5 = vcmask 0  }
  0x3c   : > { %247 = vrot.lane.b32.xlu0 %v198_v4, %s664_s4  ;;  %249 = vrot.lane.b32.xlu1 %v199_v5, %s664_s4  ;;  %v290_v41 = vrot.slane %v273_v30, 1  ;;  %v293_v52 = vrot.slane %v275_v42, 1  ;;  %v277_v61 = vmul.f32 %v236_v45, %v236_v45 }
  0x3e   : > { %v291_v53 = vsel %vm288_vm1, %v289_v40, %v290_v41  ;;  %v312_v59 = vsel %vm311_vm3, %v290_v41, 0.0  ;;  %v294_v62 = vsel %vm288_vm1, %v292_v48, %v293_v52  ;;  %v316_v9 = vsel %vm311_vm3, %v293_v52, 0.0 }
  0x3f   : > { %v310_v58 = vsel %vm309_vm2, %v291_v53, 0.0 }
  0x40   : > { %251 = vrot.lane.b32.xlu0 %v783_v6, %s664_s4  ;;  %253 = vrot.lane.b32.xlu1 %v785_v7, %s664_s4 }
  0xa6   : > { %v240_v13 = vpop.permute.xlu0 %239  ;;  %v244_v14 = vpop.permute.xlu1 %243 }
  0xa7   : > { %v263_v15 = vsub.f32 %v194_v0, %v240_v13  ;;  %v265_v16 = vsub.f32 %v196_v1, %v244_v14  ;;  %v313_v0 = vadd.f32 %v312_v59, %v310_v58  ;;  %v314_v1 = vsel %vm309_vm2, %v294_v62, 0.0 }
  0xa9   : > { %v340_v20 = vmul.f32 %v263_v15, %v263_v15  ;;  %v342_v26 = vmul.f32 %v265_v16, %v265_v16  ;;  %v315_v8 = vadd.f32 %v314_v1, %v313_v0 }
  0xaa   : > { %v242_v24 = vpop.permute.xlu0 %241  ;;  %v246_v25 = vpop.permute.xlu1 %245 }
  0xab   : > { %v264_v27 = vsub.f32 %v195_v2, %v242_v24  ;;  %356 = vrot.lane.b32.xlu0 %v340_v20, %s665_s20  ;;  %v266_v28 = vsub.f32 %v197_v3, %v246_v25  ;;  %v295_v2 = vrot.slane %v276_v60, 1  ;;  %v237_v3 = vsub.f32 %v783_v6, %v220_v54 }
  0xac   : > { %v317_v13 = vadd.f32 %v316_v9, %v315_v8 }
  0xad   : > { %v341_v32 = vmul.f32 %v264_v27, %v264_v27  ;;  %v343_v37 = vmul.f32 %v266_v28, %v266_v28  ;;  %v278_v10 = vmul.f32 %v237_v3, %v237_v3 }
  0xae   : > { %v248_v35 = vpop.permute.xlu0 %247  ;;  %v250_v36 = vpop.permute.xlu1 %249 }
  0xaf   : > { %360 = vrot.lane.b32.xlu0 %v342_v26, %s665_s20  ;;  %358 = vrot.lane.b32.xlu1 %v341_v32, %s665_s20  ;;  %v267_v38 = vsub.f32 %v198_v4, %v248_v35  ;;  %v268_v39 = vsub.f32 %v199_v5, %v250_v36  ;;  %v238_v4 = vsub.f32 %v785_v7, %v222_v63  ;;  %v296_v5 = vrot.slane %v277_v61, 1 }
  0xb0   : > { %v298_v15 = vrot.slane %v278_v10, 1 }
  0xb1   : > { %v344_v43 = vmul.f32 %v267_v38, %v267_v38  ;;  %v345_v49 = vmul.f32 %v268_v39, %v268_v39  ;;  %v279_v11 = vmul.f32 %v238_v4, %v238_v4  ;;  %v297_v12 = vsel %vm288_vm1, %v295_v2, %v296_v5 }
  0xb2   : > { %v252_v46 = vpop.permute.xlu0 %251  ;;  %v254_v47 = vpop.permute.xlu1 %253  ;;  %v318_v14 = vsel %vm309_vm2, %v297_v12, 0.0  ;;  %v320_v18 = vsel %vm311_vm3, %v296_v5, 0.0 }
  0xb3   : > { %362 = vrot.lane.b32.xlu1 %v343_v37, %s665_s20  ;;  %v269_v50 = vsub.f32 %v783_v6, %v252_v46  ;;  %364 = vrot.lane.b32.xlu0 %v344_v43, %s665_s20  ;;  %v270_v51 = vsub.f32 %v785_v7, %v254_v47  ;;  %v299_v16 = vrot.slane %v279_v11, 1  ;;  %v319_v17 = vadd.f32 %v318_v14, %v317_v13 }
  0xb4   : > { %v666_v46 = vmov 0.0  }
  0xb5   : > { %v346_v56 = vmul.f32 %v269_v50, %v269_v50  ;;  %v347_v57 = vmul.f32 %v270_v51, %v270_v51  ;;  %v300_v6 = vsel %vm288_vm1, %v298_v15, %v299_v16  ;;  %v321_v19 = vadd.f32 %v320_v18, %v319_v17  ;;  %192 = vst.msk [vmem:[%s183_s30] sm:$0x1] %vm191_vm5, %v666_v46 }
  0xb6   : > { %v322_v7 = vsel %vm309_vm2, %v300_v6, 0.0  ;;  %v324_v21 = vsel %vm311_vm3, %v299_v16, 0.0  ;;  %193 = vst.msk [vmem:[%s186_s6] sm:$0x1] %vm191_vm5, %v666_v46 }
  0xb7   : > { %366 = vrot.lane.b32.xlu1 %v345_v49, %s665_s20  ;;  %368 = vrot.lane.b32.xlu0 %v346_v56, %s665_s20  ;;  %v323_v20 = vadd.f32 %v322_v7, %v321_v19 }
  0xb9   : > { %v325_v22 = vadd.f32 %v324_v21, %v323_v20 }
  0xbb   : > { %370 = vrot.lane.b32.xlu1 %v347_v57, %s665_s20 }
  0xbc   : > { %v271_v54 = vld [vmem:[%s183_s30] sm:$0x1] }
  0xbd   : > { %v339_v0 = vld [vmem:[%s186_s6] sm:$0x1] }
  0xd6   : > { %326 = vadd.xlane.f32.xlu0 %v325_v22 }
 0x11d   : > { %v357_v23 = vpop.permute.xlu0 %356 }
 0x11e   : > { %v381_v26 = vsel %vm380_vm4, %v357_v23, 0.0 }
 0x121   : > { %v359_v24 = vpop.permute.xlu1 %358  ;;  %v361_v25 = vpop.permute.xlu0 %360 }
 0x122   : > { %v382_v27 = vsel %vm380_vm4, %v359_v24, 0.0  ;;  %v384_v29 = vsel %vm380_vm4, %v361_v25, 0.0 }
 0x123   : > { %v383_v28 = vadd.f32 %v382_v27, %v381_v26 }
 0x125   : > { %v385_v30 = vadd.f32 %v384_v29, %v383_v28  ;;  %v363_v31 = vpop.permute.xlu1 %362  ;;  %v365_v32 = vpop.permute.xlu0 %364 }
 0x126   : > { %v386_v33 = vsel %vm380_vm4, %v363_v31, 0.0  ;;  %v388_v34 = vsel %vm380_vm4, %v365_v32, 0.0 }
 0x127   : > { %v387_v35 = vadd.f32 %v386_v33, %v385_v30 }
 0x129   : > { %v389_v36 = vadd.f32 %v388_v34, %v387_v35  ;;  %v367_v37 = vpop.permute.xlu1 %366  ;;  %v369_v38 = vpop.permute.xlu0 %368 }
 0x12a   : > { %v390_v39 = vsel %vm380_vm4, %v367_v37, 0.0  ;;  %v392_v40 = vsel %vm380_vm4, %v369_v38, 0.0 }
 0x12b   : > { %v391_v41 = vadd.f32 %v390_v39, %v389_v36 }
 0x12d   : > { %v393_v42 = vadd.f32 %v392_v40, %v391_v41  ;;  %v371_v43 = vpop.permute.xlu1 %370 }
 0x12e   : > { %v394_v44 = vsel %vm380_vm4, %v371_v43, 0.0 }
 0x12f   : > { %v395_v45 = vadd.f32 %v394_v44, %v393_v42 }
 0x131   : > { %396 = vadd.xlane.f32.xlu1 %v395_v45 }
 0x163   : > { %v327_v47 = vpop.xlane.xlu0 %326 }
 0x164   : > { %v328_v48 = vrot.slane %v327_v47, 4 }
 0x166   : > { %v329_v49 = vadd.f32 %v328_v48, %v327_v47 }
 0x168   : > { %v330_v50 = vrot.slane %v329_v49, 2 }
 0x16a   : > { %v331_v51 = vadd.f32 %v330_v50, %v329_v49 }
 0x16c   : > { %v332_v52 = vrot.slane %v331_v51, 1 }
 0x16e   : > { %v333_v53 = vadd.f32 %v332_v52, %v331_v51 }
 0x170   : > { %515 = vpush %v333_v53 }
 0x1a1   : > { %s516_s7 = spop %515 }
 0x1a2   : > { %v335_v55 = vstv %s516_s7 }
 0x1a3   : > { %v336_v56 = vadd.f32 %v335_v55, %v271_v54 }
 0x1a5   : > { %338 = vst.msk [vmem:[%s183_s30] sm:$0x1] %vm191_vm5, %v336_v56 }
 0x1be   : > { %v397_v57 = vpop.xlane.xlu1 %396 }
 0x1bf   : > { %v398_v58 = vrot.slane %v397_v57, 4 }
 0x1c1   : > { %v399_v59 = vadd.f32 %v398_v58, %v397_v57 }
 0x1c3   : > { %v400_v60 = vrot.slane %v399_v59, 2 }
 0x1c5   : > { %v401_v61 = vadd.f32 %v400_v60, %v399_v59 }
 0x1c7   : > { %v402_v62 = vrot.slane %v401_v61, 1 }
 0x1c9   : > { %v403_v63 = vadd.f32 %v402_v62, %v401_v61 }
 0x1cb   : > { %517 = vpush %v403_v63 }
 0x1fc   : > { %s518_s12 = spop %517 }
 0x1fd   : > { %v405_v1 = vstv %s518_s12 }
 0x1fe   : > { %v406_v2 = vadd.f32 %v405_v1, %v339_v0 }
 0x200   : > { %407 = vst.msk [vmem:[%s186_s6] sm:$0x1] %vm191_vm5, %v406_v2 }
 0x201 PF: > { %s16_s14 = sadd.s32 1, %s659_s14   ;;  %s863_s9 = smov %s643_s10 }
 0x202   : > { %p13_p9 = scmp.ge.s32.totalorder %s16_s14, 4   ;;  %s864_s10 = smov %s647_s11 }
 0x203   : > { %s865_s11 = smov %s731_s21  ;;  %s866_s12 = smov %s655_s13 }
 0x204   : > { %s867_s13 = smov %s869_s16  ;;  %15 = sbr.rel (!%p13_p9) target bundleno = 4 (0x4), region = 80 }
 0x20b   :  { %437 = vsyncpa [#allocation3], 1 }
 0x20c   :  { %439 = vsyncpa [#allocation3 + $0x1], 1 }

</bundles_post_ra>
